<compile_context>
chip_gen: v5e
topology: v5e:2x2
jax: 0.10.0
libtpu: 0.0.40
codegen_flags: <defaults>
</compile_context>

<pallas_src>
import numpy as np
import jax
import jax.numpy as jnp
from jax.experimental import pallas as pl
from jax.experimental.pallas import tpu as pltpu

_TARGET_BLOCK_BYTES = 2 * 1024 * 1024  # ~2 MiB per x block


def _drop_path_kernel(s_ref, x_ref, o_ref):
    # s_ref: (row_tile, 1) per-sample scale in x's dtype; x_ref/o_ref: (row_tile, lane_tile).
    # Single broadcast multiply in the native dtype — purely HBM-bound.
    o_ref[...] = x_ref[...] * s_ref[...]


def _pick_tiles(B, M, itemsize):
    # Sublane (row) tile: multiple of the packed sublane granule, or the full batch dim.
    packing = max(1, 4 // itemsize)
    row_align = 8 * packing
    row_tile = B if B <= row_align else row_align
    # Lane tile: multiple of 128, sized so one x block is ~_TARGET_BLOCK_BYTES.
    m_pad = ((M + 127) // 128) * 128
    max_lanes = max(128, (_TARGET_BLOCK_BYTES // max(1, row_tile * itemsize)) // 128 * 128)
    lane_tile = min(m_pad, max_lanes)
    return row_tile, lane_tile


def drop_path(x, drop_prob: float = 0.0, training: bool = False, *, key=None):
    """Functional drop_path matching the PyTorch reference."""
    if drop_prob is None:
        drop_prob = 0.0
    drop_prob = float(drop_prob)
    if drop_prob == 0.0 or not training:
        return x
    if key is None:
        raise ValueError(
            "drop_path: a PRNG `key` is required when training=True and drop_prob > 0.")

    keep_prob = 1.0 - drop_prob
    orig_shape = x.shape
    B = int(orig_shape[0])
    M = int(np.prod(orig_shape[1:])) if len(orig_shape) > 1 else 1

    # Per-sample keep mask folded with the 1/keep_prob scale (B values, negligible work).
    u = jax.random.uniform(key, (B, 1), dtype=jnp.float32)
    scale = (jnp.floor(keep_prob + u) / keep_prob).astype(x.dtype)

    # Lane-dense flatten: contiguous reshape, no extra HBM pass. No padding; the grid
    # below uses cdiv and Pallas masks the ragged edge blocks.
    x2 = x.reshape(B, M)
    itemsize = jnp.dtype(x2.dtype).itemsize
    row_tile, lane_tile = _pick_tiles(B, M, itemsize)
    grid = (pl.cdiv(B, row_tile), pl.cdiv(M, lane_tile))

    out = pl.pallas_call(
        _drop_path_kernel,
        out_shape=jax.ShapeDtypeStruct((B, M), x2.dtype),
        grid=grid,
        in_specs=[pl.BlockSpec((row_tile, 1), lambda i, j: (i, 0)),
                  pl.BlockSpec((row_tile, lane_tile), lambda i, j: (i, j))],
        out_specs=pl.BlockSpec((row_tile, lane_tile), lambda i, j: (i, j)),
        compiler_params=pltpu.CompilerParams(
            dimension_semantics=("parallel", "parallel"),
            vmem_limit_bytes=32 * 1024 * 1024),
    )(scale, x2)

    return out.reshape(orig_shape)


class DropPath:
    """Module-style wrapper mirroring nn.Module DropPath."""

    def __init__(self, drop_prob=None):
        self.drop_prob = drop_prob
        self.training = False

    def __call__(self, x, *, key=None):
        p = 0.0 if self.drop_prob is None else self.drop_prob
        return drop_path(x, p, self.training, key=key)


if __name__ == "__main__":
    key = jax.random.PRNGKey(0)
    kx, km = jax.random.split(key)

    # Small shapes consistent with the module's typical 4-D NCHW activations.
    x = jax.random.normal(kx, (2, 4, 16, 16), jnp.float32)
    drop_prob = 0.25
    keep_prob = 1.0 - drop_prob

    # Eval / drop_prob=0 path is the identity (exactly as in the PyTorch module).
    y_eval = drop_path(x, drop_prob, training=False)
    assert y_eval.shape == x.shape
    np.testing.assert_array_equal(np.asarray(y_eval), np.asarray(x))

    # Training path exercises the Pallas kernel (f32, native dtype, no pad/slice).
    fwd = jax.jit(lambda xx: drop_path(xx, drop_prob, True, key=km))
    y = fwd(x)
    jax.block_until_ready(y)
    assert y.shape == x.shape

    # Pure-JAX reference using the identical RNG draw (PyTorch formula).
    u_ref = jax.random.uniform(km, (x.shape[0], 1), dtype=jnp.float32)
    mask_ref = jnp.floor(keep_prob + u_ref).reshape(x.shape[0], 1, 1, 1)
    ref = x / keep_prob * mask_ref
    np.testing.assert_allclose(np.asarray(y), np.asarray(ref), rtol=1e-6, atol=1e-6)

    # Native-dtype (bf16) path: no wrapper casts, kernel runs in bf16.
    x_bf16 = x.astype(jnp.bfloat16)
    y_bf16 = jax.jit(lambda xx: drop_path(xx, drop_prob, True, key=km))(x_bf16)
    jax.block_until_ready(y_bf16)
    assert y_bf16.dtype == jnp.bfloat16 and y_bf16.shape == x.shape
    np.testing.assert_allclose(np.asarray(y_bf16, dtype=np.float32), np.asarray(ref),
                               rtol=2e-2, atol=2e-2)

    print("KERNEL_OK")
</pallas_src>

<mosaic_0001>
module attributes {stable_mosaic.version = 11 : i64} {
  func.func @_drop_path_kernel(%arg0: i32, %arg1: i32, %arg2: memref<2x1xf32, #tpu.memory_space<vmem>>, %arg3: memref<2x1024xf32, #tpu.memory_space<vmem>>, %arg4: memref<2x1024xf32, #tpu.memory_space<vmem>>) attributes {dimension_semantics = [#tpu.dimension_semantics<parallel>, #tpu.dimension_semantics<parallel>], iteration_bounds = array<i64: 1, 1>, scalar_prefetch = 0 : i64, scratch_operands = 0 : i64, tpu.core_type = #tpu.core_type<tc>, window_params = [{transform_indices = @transform_0, window_bounds = array<i64: 2, 1>}, {transform_indices = @transform_1, window_bounds = array<i64: 2, 1024>}, {transform_indices = @transform_2, window_bounds = array<i64: 2, 1024>}]} {
    %c0 = arith.constant 0 : index
    %c0_0 = arith.constant 0 : index
    %0 = vector.load %arg3[%c0, %c0_0] : memref<2x1024xf32, #tpu.memory_space<vmem>>, vector<2x1024xf32>
    %c0_1 = arith.constant 0 : index
    %c0_2 = arith.constant 0 : index
    %1 = vector.load %arg2[%c0_1, %c0_2] : memref<2x1xf32, #tpu.memory_space<vmem>>, vector<2x1xf32>
    %2 = vector.broadcast %1 : vector<2x1xf32> to vector<2x1024xf32>
    %3 = arith.mulf %0, %2 : vector<2x1024xf32>
    %c0_3 = arith.constant 0 : index
    %c0_4 = arith.constant 0 : index
    %4 = vector.load %arg4[%c0_3, %c0_4] : memref<2x1024xf32, #tpu.memory_space<vmem>>, vector<2x1024xf32>
    tpu.vector_store %arg4[%c0_3, %c0_4], %3 {strides = array<i32>} : memref<2x1024xf32, #tpu.memory_space<vmem>>, vector<2x1024xf32>,
    return
  }
  func.func @transform_0(%arg0: i32, %arg1: i32) -> (i32, i32) {
    %c0_i32 = arith.constant 0 : i32
    %c0_i32_0 = arith.constant 0 : i32
    return %arg0, %c0_i32 : i32, i32
  }
  func.func @transform_1(%arg0: i32, %arg1: i32) -> (i32, i32) {
    %c0_i32 = arith.constant 0 : i32
    return %arg0, %arg1 : i32, i32
  }
  func.func @transform_2(%arg0: i32, %arg1: i32) -> (i32, i32) {
    %c0_i32 = arith.constant 0 : i32
    return %arg0, %arg1 : i32, i32
  }
}

</mosaic_0001>

<bundles_post_ra>
// kernel: _lambda_.1
= control target key start
LH: loop header
LB: loop body
LE: loop exit
PB: predicated region body
PF: predicated region fallthrough
CT: control target
= control target key end

     0   :  { %v34_v0 = vmov 0   ;;  %v35_v2 = vmov 269488144   ;;  %s66_s0 = inlined_call_operand.vmem [shape: f32[2,1], index: 0, kind: input, shape index: {}]   ;;  %s67_s1 = inlined_call_operand.vmem [shape: f32[2,1024], index: 1, kind: input, shape index: {}]   ;;  %s68_s2 = inlined_call_operand.vmem [shape: f32[2,1024], index: 2, kind: output, shape index: {}]  }
   0x1   :  { %33 = vset.pattern.permute.xlu0 %v34_v0  ;;  %v13_v1 = vld [vmem:[%s66_s0] sm:$0x3]  ;;  %v19_v3 = vunpack.c.l.s4 %v35_v2  ;;  %v12_v6 = vld [vmem:[%s67_s1 + $0x8] sm:$0xff] }
   0x2   :  { %16 = vperm.xlu0 %33, %v13_v1   ;;  %v11_v5 = vld [vmem:[%s67_s1] sm:$0xff] }
   0x3   :  { %v20_v4 = vunpack.c.0.s8 %v19_v3 }
  0x74   :  { %v17_v7 = vpop.permute.xlu0 %16 }
  0x75   :  { %v21_v8 = vperm.slane %v17_v7, %v20_v4 }
  0x77   :  { %v23_v9 = vmul.f32 %v21_v8, %v11_v5  ;;  %v24_v10 = vmul.f32 %v21_v8, %v12_v6 }
  0x79   :  { %25 = vst [vmem:[%s68_s2] sm:$0xff] %v23_v9 }
  0x7a   :  { %26 = vst [vmem:[%s68_s2 + $0x8] sm:$0xff] %v24_v10 }

</bundles_post_ra>
